<compile_context>
chip_gen: v7x
topology: tpu7x:2x2x1
jax: 0.10.0
libtpu: 0.0.40
codegen_flags: <defaults>
</compile_context>

<pallas_src>
import jax
import jax.numpy as jnp
from jax import lax
from jax.experimental import pallas as pl
from jax.experimental.pallas import tpu as pltpu


def _decoder_kernel(pair_ref, c_ref, b1_ref, w2_ref, b2_ref, o_ref):
    # pair_ref : [2, tile_e] int32    (row 0 = start ids, row 1 = end ids)
    # c_ref    : [H, 2N]              folded weights*features (compute_dtype)
    # b1_ref   : [H, 1]  f32
    # w2_ref   : [H, 1]  f32
    # b2_ref   : [1]     f32 (SMEM scalar)
    # o_ref    : [1, tile_e]          lane-dense output row
    compute_dtype = c_ref.dtype
    two_n = c_ref.shape[1]
    n = two_n // 2

    idx_s = pair_ref[0:1, :]                         # [1, tile_e], in [0, N)
    idx_e = pair_ref[1:2, :] + n                     # [1, tile_e], in [N, 2N)

    # Column iota + broadcast compare -> combined one-hot [2N, tile_e].
    row_ids = lax.broadcasted_iota(jnp.int32, (two_n, 1), 0)
    onehot = jnp.logical_or(row_ids == idx_s, row_ids == idx_e)
    onehot = onehot.astype(compute_dtype)            # MXU operand dtype only

    # Single MXU matmul: hT[h, r] = W1s^T x[s_r] + W1e^T x[e_r]  (f32 acc).
    hT = jnp.dot(c_ref[...], onehot, preferred_element_type=jnp.float32)
    hT = jnp.maximum(hT + b1_ref[...], 0.0)          # bias + ReLU in f32 (VPU)

    # Output layer (H -> 1): VPU multiply + sublane (XLU) reduce, f32.
    out_row = jnp.sum(hT * w2_ref[...], axis=0, keepdims=True) + b2_ref[0]
    o_ref[...] = out_row.astype(o_ref.dtype)


def gnn_decoder_forward(x, junc_index_pair, params, *, tile_e=512,
                        compute_dtype=jnp.bfloat16,
                        vmem_limit_bytes=32 * 1024 * 1024):
    """x: [N, D] float32, junc_index_pair: [E, 2] int32 -> pred: [E] float32."""
    w1, b1, w2, b2 = params["w1"], params["b1"], params["w2"], params["b2"]
    N, D = x.shape
    E = junc_index_pair.shape[0]
    H = w1.shape[1]
    assert w1.shape == (2 * D, H)

    # Keep >= 2 grid steps when possible so v7x's two TensorCores both work.
    while tile_e > 128 and -(-E // tile_e) < 2:
        tile_e //= 2
    num_tiles = -(-E // tile_e)
    E_pad = num_tiles * tile_e

    pair = junc_index_pair.astype(jnp.int32)
    if E_pad != E:
        pair = jnp.concatenate(
            [pair, jnp.zeros((E_pad - E, 2), jnp.int32)], axis=0)
    pair_t = pair.T                                         # [2, E_pad]

    # Fold W1 into x once (f32 in XLA), then cast only the MXU operand.
    c_start = w1[:D, :].T @ x.T                             # [H, N]
    c_end = w1[D:, :].T @ x.T                               # [H, N]
    C = jnp.concatenate([c_start, c_end], axis=1).astype(compute_dtype)  # [H, 2N]

    b1c = b1.reshape(H, 1).astype(jnp.float32)              # [H, 1]
    w2c = w2.reshape(H, 1).astype(jnp.float32)              # [H, 1]
    b2s = b2.reshape(1).astype(jnp.float32)                 # [1]  -> SMEM

    out = pl.pallas_call(
        _decoder_kernel,
        out_shape=jax.ShapeDtypeStruct((1, E_pad), jnp.float32),
        grid_spec=pltpu.PrefetchScalarGridSpec(
            num_scalar_prefetch=0,
            grid=(num_tiles,),
            in_specs=[
                pl.BlockSpec((2, tile_e), lambda i: (0, i)),        # edge ids
                pl.BlockSpec((H, 2 * N), lambda i: (0, 0)),         # folded C
                pl.BlockSpec((H, 1), lambda i: (0, 0)),             # b1
                pl.BlockSpec((H, 1), lambda i: (0, 0)),             # W2 column
                pl.BlockSpec(memory_space=pltpu.MemorySpace.SMEM),  # b2 scalar
            ],
            out_specs=pl.BlockSpec((1, tile_e), lambda i: (0, i)),
        ),
        compiler_params=pltpu.CompilerParams(
            dimension_semantics=("parallel",),
            vmem_limit_bytes=vmem_limit_bytes),
    )(pair_t, C, b1c, w2c, b2s)

    return out.reshape(E_pad)[:E]          # .squeeze() -> [E]


def init_params(key, dim_in):
    """Deterministic synthetic parameters for the post-MP MLP.

    layers_post_mp = 2:
      layer 1: Linear(2*dim_in -> hidden) + ReLU
      layer 2: Linear(hidden -> 1), bias, no activation.
    """
    hidden = 2 * dim_in
    k1, k2 = jax.random.split(key, 2)
    w1 = jax.random.normal(k1, (2 * dim_in, hidden), jnp.float32) * 0.1
    b1 = jnp.zeros((hidden,), jnp.float32)
    w2 = jax.random.normal(k2, (hidden, 1), jnp.float32) * 0.1
    b2 = jnp.zeros((1,), jnp.float32)
    return {"w1": w1, "b1": b1, "w2": w2, "b2": b2}


def _reference_forward(x, junc_index_pair, params):
    """Pure-JAX reference matching the PyTorch forward."""
    s = x[junc_index_pair[:, 0]]
    e = x[junc_index_pair[:, 1]]
    cat = jnp.concatenate([s, e], axis=1)
    h = jnp.maximum(cat @ params["w1"] + params["b1"], 0.0)
    out = h @ params["w2"] + params["b2"]
    return jnp.squeeze(out)


if __name__ == "__main__":
    key = jax.random.PRNGKey(0)
    k_x, k_pair, k_param = jax.random.split(key, 3)

    N = 64            # number of graph nodes
    D = 32            # dim_in (node feature dim)
    E = 1000          # number of candidate edges (not tile-aligned on purpose)

    x = jax.random.normal(k_x, (N, D), jnp.float32)
    junc_index_pair = jax.random.randint(k_pair, (E, 2), 0, N, dtype=jnp.int32)
    params = init_params(k_param, D)

    ref = _reference_forward(x, junc_index_pair, params)

    # Default path: bf16 MXU operands, f32 accumulation / elementwise.
    pred = gnn_decoder_forward(x, junc_index_pair, params)
    pred = jax.block_until_ready(pred)
    assert pred.shape == (E,)
    assert jnp.allclose(pred, ref, atol=5e-2, rtol=5e-2), "bf16 mismatch vs reference"

    # f32 path: tight-tolerance check against the reference.
    pred_f32 = gnn_decoder_forward(x, junc_index_pair, params,
                                   compute_dtype=jnp.float32)
    pred_f32 = jax.block_until_ready(pred_f32)
    assert jnp.allclose(pred_f32, ref, atol=1e-4, rtol=1e-4), "f32 mismatch vs reference"

    print("KERNEL_OK")
</pallas_src>

<mosaic_0001>
module attributes {stable_mosaic.version = 11 : i64} {
  func.func @_decoder_kernel(%arg0: i32, %arg1: memref<2x512xi32, #tpu.memory_space<vmem>>, %arg2: memref<64x128xbf16, #tpu.memory_space<vmem>>, %arg3: memref<64x1xf32, #tpu.memory_space<vmem>>, %arg4: memref<64x1xf32, #tpu.memory_space<vmem>>, %arg5: memref<1xf32, #tpu.memory_space<smem>>, %arg6: memref<1x512xf32, #tpu.memory_space<vmem>>) attributes {dimension_semantics = [#tpu.dimension_semantics<parallel>], iteration_bounds = array<i64: 2>, scalar_prefetch = 0 : i64, scratch_operands = 0 : i64, tpu.core_type = #tpu.core_type<tc>, window_params = [{transform_indices = @transform_0, window_bounds = array<i64: 2, 512>}, {pipeline_mode = #tpu.pipeline_mode<synchronous>, transform_indices = @transform_1, window_bounds = array<i64: 64, 128>}, {pipeline_mode = #tpu.pipeline_mode<synchronous>, transform_indices = @transform_2, window_bounds = array<i64: 64, 1>}, {pipeline_mode = #tpu.pipeline_mode<synchronous>, transform_indices = @transform_3, window_bounds = array<i64: 64, 1>}, {transform_indices = @transform_4, window_bounds = array<i64: 1>}, {transform_indices = @transform_5, window_bounds = array<i64: 1, 512>}]} {
    %c0 = arith.constant 0 : index
    %c0_0 = arith.constant 0 : index
    %0 = vector.load %arg1[%c0, %c0_0] : memref<2x512xi32, #tpu.memory_space<vmem>>, vector<1x512xi32>
    %c1 = arith.constant 1 : index
    %c0_1 = arith.constant 0 : index
    %1 = vector.load %arg1[%c1, %c0_1] : memref<2x512xi32, #tpu.memory_space<vmem>>, vector<1x512xi32>
    %c64_i32 = arith.constant 64 : i32
    %2 = vector.broadcast %c64_i32 : i32 to vector<1x512xi32>
    %3 = arith.addi %1, %2 : vector<1x512xi32>
    %4 = tpu.iota {dimensions = array<i32: 0>} : vector<128x1xi32>
    %5 = vector.broadcast %4 : vector<128x1xi32> to vector<128x512xi32>
    %6 = vector.broadcast %0 : vector<1x512xi32> to vector<128x512xi32>
    %7 = arith.cmpi eq, %5, %6 : vector<128x512xi32>
    %8 = vector.broadcast %4 : vector<128x1xi32> to vector<128x512xi32>
    %9 = vector.broadcast %3 : vector<1x512xi32> to vector<128x512xi32>
    %10 = arith.cmpi eq, %8, %9 : vector<128x512xi32>
    %11 = arith.ori %7, %10 : vector<128x512xi1>
    %12 = arith.extui %11 : vector<128x512xi1> to vector<128x512xi32>
    %13 = arith.sitofp %12 : vector<128x512xi32> to vector<128x512xf32>
    %14 = arith.truncf %13 : vector<128x512xf32> to vector<128x512xbf16>
    %c0_2 = arith.constant 0 : index
    %c0_3 = arith.constant 0 : index
    %15 = vector.load %arg2[%c0_2, %c0_3] : memref<64x128xbf16, #tpu.memory_space<vmem>>, vector<64x128xbf16>
    %cst = arith.constant dense<0.000000e+00> : vector<64x512xf32>
    %16 = tpu.matmul %15, %14, %cst {dimension_numbers = #tpu.dot_dimension_numbers<[1], [0], [0], [1], [0, 0, 1, 1], [], []>} : vector<64x128xbf16>, vector<128x512xbf16>, vector<64x512xf32> -> vector<64x512xf32>
    %c0_4 = arith.constant 0 : index
    %c0_5 = arith.constant 0 : index
    %17 = vector.load %arg3[%c0_4, %c0_5] : memref<64x1xf32, #tpu.memory_space<vmem>>, vector<64x1xf32>
    %18 = vector.broadcast %17 : vector<64x1xf32> to vector<64x512xf32>
    %19 = arith.addf %16, %18 : vector<64x512xf32>
    %cst_6 = arith.constant 0.000000e+00 : f32
    %20 = vector.broadcast %cst_6 : f32 to vector<64x512xf32>
    %21 = arith.maximumf %19, %20 : vector<64x512xf32>
    %c0_7 = arith.constant 0 : index
    %c0_8 = arith.constant 0 : index
    %22 = vector.load %arg4[%c0_7, %c0_8] : memref<64x1xf32, #tpu.memory_space<vmem>>, vector<64x1xf32>
    %23 = vector.broadcast %22 : vector<64x1xf32> to vector<64x512xf32>
    %24 = arith.mulf %21, %23 : vector<64x512xf32>
    %cst_9 = arith.constant dense<0.000000e+00> : vector<512xf32>
    %25 = vector.multi_reduction <add>, %24, %cst_9 [0] : vector<64x512xf32> to vector<512xf32>
    %26 = vector.shape_cast %25 : vector<512xf32> to vector<1x512xf32>
    %c0_10 = arith.constant 0 : index
    %27 = memref.load %arg5[%c0_10] : memref<1xf32, #tpu.memory_space<smem>>
    %28 = vector.broadcast %27 : f32 to vector<1x512xf32>
    %29 = arith.addf %26, %28 : vector<1x512xf32>
    %c0_11 = arith.constant 0 : index
    %c0_12 = arith.constant 0 : index
    %30 = vector.load %arg6[%c0_11, %c0_12] : memref<1x512xf32, #tpu.memory_space<vmem>>, vector<1x512xf32>
    tpu.vector_store %arg6[%c0_11, %c0_12], %29 {strides = array<i32>} : memref<1x512xf32, #tpu.memory_space<vmem>>, vector<1x512xf32>,
    return
  }
  func.func @transform_0(%arg0: i32) -> (i32, i32) {
    %c0_i32 = arith.constant 0 : i32
    %c0_i32_0 = arith.constant 0 : i32
    return %c0_i32, %arg0 : i32, i32
  }
  func.func @transform_1(%arg0: i32) -> (i32, i32) {
    %c0_i32 = arith.constant 0 : i32
    %c0_i32_0 = arith.constant 0 : i32
    %c0_i32_1 = arith.constant 0 : i32
    return %c0_i32, %c0_i32_0 : i32, i32
  }
  func.func @transform_2(%arg0: i32) -> (i32, i32) {
    %c0_i32 = arith.constant 0 : i32
    %c0_i32_0 = arith.constant 0 : i32
    %c0_i32_1 = arith.constant 0 : i32
    return %c0_i32, %c0_i32_0 : i32, i32
  }
  func.func @transform_3(%arg0: i32) -> (i32, i32) {
    %c0_i32 = arith.constant 0 : i32
    %c0_i32_0 = arith.constant 0 : i32
    %c0_i32_1 = arith.constant 0 : i32
    return %c0_i32, %c0_i32_0 : i32, i32
  }
  func.func @transform_4(%arg0: i32) -> i32 {
    %c0_i32 = arith.constant 0 : i32
    %c0_i32_0 = arith.constant 0 : i32
    return %c0_i32 : i32
  }
  func.func @transform_5(%arg0: i32) -> (i32, i32) {
    %c0_i32 = arith.constant 0 : i32
    %c0_i32_0 = arith.constant 0 : i32
    return %c0_i32, %arg0 : i32, i32
  }
}

</mosaic_0001>

<bundles_post_ra>
// kernel: tpu_custom_call.1
= control target key start
LH: loop header
LB: loop body
LE: loop exit
PB: predicated region body
PF: predicated region fallthrough
CT: control target
= control target key end

     0   :  { %s1849_s0 = inlined_call_operand.vmem [shape: s32[2,1024], index: 0, kind: input, shape index: {}]   ;;  %s1850_s1 = inlined_call_operand.vmem [shape: bf16[64,128], index: 1, kind: input, shape index: {}]   ;;  %s1851_s2 = inlined_call_operand.vmem [shape: f32[64,1], index: 2, kind: input, shape index: {}]   ;;  %s1852_s3 = inlined_call_operand.vmem [shape: f32[64,1], index: 3, kind: input, shape index: {}]   ;;  %s1853_s4 = inlined_call_operand.<no memory space> [shape: f32[1], index: 4, kind: input, shape index: {}]   ;;  %s1854_s5 = inlined_call_operand.hbm [shape: f32[1,1024], index: 5, kind: output, shape index: {}]  }
   0x1   :  { %10 = sst [smem:[#allocation2]] %s1853_s4 }
   0x2   :  { %11 = vsyncpa [#allocation4], 0 }
   0x3   :  { %13 = vsyncpa [#allocation4 + $0x1], 0  ;;  %s1432_s20 = smov 0   ;;  %s1434_s21 = smov 0  }
   0x4   :  { %s1436_s22 = smov 0   ;;  %s1438_s23 = smov 0  }
   0x5 LB: > { %s1453_s4 = sadd.s32 4294967295, %s1393_s23   ;;  %s1137_s24 = sadd.s32 4294967294, %s1393_s23   ;;  %s1393_s23 = sphi %s1438_s23, %s1860_s23   ;;  %s1389_s22 = sphi %s1436_s22, %s1859_s22   ;;  %s1385_s21 = sphi %s1434_s21, %s1858_s21   ;;  %s1381_s20 = sphi %s1432_s20, %s1857_s20  }
   0x6   : > { %s1457_s25 = sadd.s32 1, %s1393_s23   ;;  %s136_s26 = sadd.s32 1, %s1389_s22 }
   0x7   : > { %s133_s27 = ssub.s32 %s1393_s23, %s1457_s25  ;;  %p146_p0 = scmp.ne.s32.totalorder %s1389_s22, %s1385_s21 }
   0x8   : > { %p134_p1 = scmp.eq.s32.totalorder %s133_s27, 0  ;;  %p147_p2 = scmp.eq.s32.totalorder %s1453_s4, 1 }
   0x9   : > { %p152_p3 = scmp.ne.s32.totalorder %s1385_s21, %s1381_s20  ;;  %p153_p4 = scmp.eq.s32.totalorder %s1137_s24, 1 }
   0xa   : > { %s1468_s28 = scalar_select %p134_p1, %s1389_s22, %s136_s26  }
   0xb   : > { %p1470_p5 = por %p147_p2, %p146_p0  ;;  %p1474_p6 = por %p153_p4, %p152_p3 }
   0xc   : > { %p1140_p7 = scmp.ge.s32.totalorder %s1393_s23, 1  ;;  %p192_p8 = scmp.lt.s32.totalorder %s1393_s23, 3 }
   0xe   : > { %p193_p9 = pnand %p1140_p7, %p192_p8 }
   0xf   : > { %s1142_s6 = sshll.u32 (!%p193_p9), %s1453_s4, 2  ;;  %v232_v0 = vlaneseq (!%p193_p9)  ;;  %v1395_v1 = vmov (!%p193_p9), 0   ;;  %v641_v11 = vld [vmem:[%s1851_s2] sm:$0xff] (!%p193_p9)  ;;  %v643_v12 = vld [vmem:[%s1851_s2 + $0x10] sm:$0xff] (!%p193_p9)  ;;  %v642_v15 = vld [vmem:[%s1851_s2 + $0x8] sm:$0xff] (!%p193_p9)  ;;  %s1023_s17 = sld [smem:[#allocation2]] (!%p193_p9) }
  0x10   : > { %196 = sbr.rel (%p193_p9) target bundleno = 414 (0x19e), region = 40  ;;  %p221_p10 = scmp.lt.s32.totalorder (!%p193_p9), %s1142_s6, 7  ;;  %745 = vmatprep.mubr.bf16.mxu0 (!%p193_p9), %v1395_v1  ;;  %818 = vmatprep.mubr.bf16.mxu1 (!%p193_p9), %v1395_v1  ;;  %v644_v18 = vld [vmem:[%s1851_s2 + $0x18] sm:$0xff] (!%p193_p9)  ;;  %v891_v21 = vld [vmem:[%s1852_s3] sm:$0xff] (!%p193_p9)  ;;  %v892_v24 = vld [vmem:[%s1852_s3 + $0x8] sm:$0xff] (!%p193_p9) }
  0x11   : > { %v1484_v2 = vshrl.u32 (!%p193_p9), %v232_v0, 7  ;;  %1325 = vset.pattern.permute.xlu0 (!%p193_p9), %v1395_v1  ;;  %1326 = vset.pattern.permute.xlu1 (!%p193_p9), %v1395_v1  ;;  %v1396_v25 = vmov (!%p193_p9), 1.0|1.0   ;;  %v645_v27 = vld [vmem:[%s1851_s2 + $0x20] sm:$0xff] (!%p193_p9)  ;;  %v893_v29 = vld [vmem:[%s1852_s3 + $0x10] sm:$0xff] (!%p193_p9)  ;;  %v646_v30 = vld [vmem:[%s1851_s2 + $0x28] sm:$0xff] (!%p193_p9) }
  0x12   : > { %651 = vperm.xlu0 (!%p193_p9), %1325, %v641_v11   ;;  %661 = vperm.xlu1 (!%p193_p9), %1326, %v643_v12   ;;  %v894_v31 = vld [vmem:[%s1852_s3 + $0x18] sm:$0xff] (!%p193_p9)  ;;  %v647_v32 = vld [vmem:[%s1851_s2 + $0x30] sm:$0xff] (!%p193_p9)  ;;  %v895_v33 = vld [vmem:[%s1852_s3 + $0x20] sm:$0xff] (!%p193_p9)  ;;  %s217_s18 = sand.u32 (!%p193_p9), 1, %s1385_s21   ;;  %s1282_s24 = sshll.u32 (!%p193_p9), %s1453_s4, 6 }
  0x13   : > { %v255_v3 = vsub.s32 (!%p193_p9), 1, %v1484_v2  ;;  %v263_v4 = vsub.s32 (!%p193_p9), 3, %v1484_v2  ;;  %v1494_v5 = vadd.s32 (!%p193_p9), 8, %v1484_v2  ;;  %v251_v10 = vsub.s32 (!%p193_p9), 0, %v1484_v2  ;;  %v648_v36 = vld [vmem:[%s1851_s2 + $0x38] sm:$0xff] (!%p193_p9)  ;;  %v896_v37 = vld [vmem:[%s1852_s3 + $0x28] sm:$0xff] (!%p193_p9)  ;;  %s1807_s8 = scalar_lea.hbm (!%p193_p9), %s1854_s5, %s1282_s24 }
  0x14   : > { %v259_v17 = vsub.s32 (!%p193_p9), 2, %v1484_v2  ;;  %v235_v26 = vadd.s32 (!%p193_p9), 16, %v1484_v2  ;;  %v236_v28 = vadd.s32 (!%p193_p9), 24, %v1484_v2  ;;  %v237_v34 = vadd.s32 (!%p193_p9), 32, %v1484_v2  ;;  %v897_v38 = vld [vmem:[%s1852_s3 + $0x30] sm:$0xff] (!%p193_p9)  ;;  %v898_v39 = vld [vmem:[%s1852_s3 + $0x38] sm:$0xff] (!%p193_p9) }
  0x15   : > { %v238_v35 = vadd.s32 (!%p193_p9), 40, %v1484_v2  ;;  %v239_v40 = vadd.s32 (!%p193_p9), 48, %v1484_v2  ;;  %v240_v41 = vadd.s32 (!%p193_p9), 56, %v1484_v2  ;;  %v241_v42 = vadd.s32 (!%p193_p9), 64, %v1484_v2  ;;  %v1327_v50 = vld [vmem:[%s1850_s1] sm:$0xff] (!%p193_p9)   ;;  %v1328_v51 = vld [vmem:[%s1850_s1 + $0x8] sm:$0xff] (!%p193_p9)  }
  0x16   : > { %656 = vperm.xlu0 (!%p193_p9), %1325, %v642_v15   ;;  %666 = vperm.xlu1 (!%p193_p9), %1326, %v644_v18   ;;  %v242_v43 = vadd.s32 (!%p193_p9), 72, %v1484_v2  ;;  %v243_v44 = vadd.s32 (!%p193_p9), 80, %v1484_v2  ;;  %v244_v45 = vadd.s32 (!%p193_p9), 88, %v1484_v2  ;;  %v245_v46 = vadd.s32 (!%p193_p9), 96, %v1484_v2  ;;  %v1329_v52 = vld [vmem:[%s1850_s1 + $0x10] sm:$0xff] (!%p193_p9)   ;;  %v1330_v53 = vld [vmem:[%s1850_s1 + $0x18] sm:$0xff] (!%p193_p9)  }
  0x17   : > { %s1862_s6 = smov (!%p221_p10, %s1142_s6), 7  ;;  %v246_v47 = vadd.s32 104, %v1484_v2  ;;  %v247_v48 = vadd.s32 112, %v1484_v2  ;;  %v248_v49 = vadd.s32 120, %v1484_v2  ;;  %s1141_s19 = sshll.u32 %s217_s18, 2 }
  0x18   : > { %s1143_s7 = sshll.u32 %s1862_s6, 1  ;;  %s219_s26 = scalar_lea.vmem [#allocation3], %s1141_s19 }
  0x19   : > { %s224_s10 = scalar_lea.vmem %s1849_s0, %s1143_s7  ;;  %s1078_s27 = sshll.u32 %s219_s26, 4  ;;  %s1809_s27 = int_to_ptr.vmem [resolvable:$true] %s1078_s27 }
  0x1a   : > { %v228_v6 = vld [vmem:[%s224_s10] ss:$2 sm:$0xf]  ;;  %v1144_v7 = vld [vmem:[%s224_s10 + $0x1] ss:$2 sm:$0xf]  ;;  %901 = vperm.xlu0 %1325, %v891_v21   ;;  %906 = vperm.xlu1 %1326, %v892_v24  }
  0x1b   : > { %v231_v8 = vadd.s32 64, %v1144_v7  ;;  %v1496_v9 = vrot.slane %v228_v6, %v255_v3  ;;  %v1505_v13 = vrot.slane %v228_v6, %v263_v4  ;;  %v1526_v19 = vrot.slane %v228_v6, %v251_v10  ;;  %s1064_s9 = scalar_lea.sflag [#allocation4], %s217_s18  ;;  %s1331_s10 = scalar_lea.vmem %s1809_s27, 64 }
  0x1c   : > { %v1541_v22 = vrot.slane %v228_v6, %v259_v17  ;;  %p1332_p11 = scmp.ne.s32.totalorder %s1809_s27, %s1331_s10  ;;  %s1398_s4 = smov [#allocation3]  }
  0x1d   : > { %vm266_vm0 = vcmp.eq.s32.totalorder %v1484_v2, %v1496_v9  ;;  %v1509_v14 = vrot.slane %v231_v8, %v255_v3  ;;  %vm270_vm1 = vcmp.eq.s32.totalorder %v1494_v5, %v1496_v9  ;;  %v1516_v16 = vrot.slane %v231_v8, %v263_v4  ;;  %s1335_s11 = sshll.u32 %s1398_s4, 4  ;;  %s1336_s11 = int_to_ptr.vmem [resolvable:$false] %s1335_s11 }
  0x1e   : > { %v1528_v20 = vrot.slane %v231_v8, %v251_v10  ;;  %vm268_vm5 = vcmp.eq.s32.totalorder %v1484_v2, %v1505_v13  ;;  %vm272_vm8 = vcmp.eq.s32.totalorder %v1494_v5, %v1505_v13  ;;  %v1543_v23 = vrot.slane %v231_v8, %v259_v17  ;;  %671 = vperm.xlu0 %1325, %v645_v27   ;;  %p1333_p12 = pnand %p1332_p11, %p1470_p5  ;;  %s1337_s12 = scalar_lea.vmem %s1336_s11, 128 }
  0x1f   : > { %vm346_vm2 = vcmp.eq.s32.totalorder %v1484_v2, %v1509_v14  ;;  %vm350_vm3 = vcmp.eq.s32.totalorder %v1494_v5, %v1509_v14  ;;  %vm348_vm6 = vcmp.eq.s32.totalorder %v1484_v2, %v1516_v16  ;;  %vm352_vm9 = vcmp.eq.s32.totalorder %v1494_v5, %v1516_v16  ;;  %911 = vperm.xlu1 %1326, %v893_v29   ;;  %p1338_p0 = scmp.lt.s32.totalorder %s1809_s27, %s1336_s11  ;;  %p1339_p1 = scmp.lt.s32.totalorder %s1337_s12, %s1331_s10 }
  0x20   : > { %vm410_vm4 = vmor %vm266_vm0, %vm346_vm2  ;;  %vm265_vm12 = vcmp.eq.s32.totalorder %v1484_v2, %v1526_v19  ;;  %vm345_vm13 = vcmp.eq.s32.totalorder %v1484_v2, %v1528_v20  ;;  %vm269_vm15 = vcmp.eq.s32.totalorder %v1494_v5, %v1526_v19  ;;  %vm349_vm0 = vcmp.eq.s32.totalorder %v1494_v5, %v1528_v20  ;;  %p1334_p13 = pneg %p1333_p12 }
  0x21   : > { %vm414_vm7 = vmor %vm270_vm1, %vm350_vm3  ;;  %vm267_vm3 = vcmp.eq.s32.totalorder %v1484_v2, %v1541_v22  ;;  %p1340_p2 = por %p1339_p1, %p1338_p0 }
  0x22   : > { %vm1213_vm10 = vmpackc.low %vm414_vm7, %vm410_vm4  ;;  %vm347_vm4 = vcmp.eq.s32.totalorder %v1484_v2, %v1543_v23  ;;  %vm351_vm7 = vcmp.eq.s32.totalorder %v1494_v5, %v1543_v23  ;;  %676 = vperm.xlu0 %1325, %v646_v30  }
  0x23   : > { %1214 = vmatprep.subr.msk.bf16.mxu0 %vm1213_vm10, %v1396_v25  ;;  %vm412_vm11 = vmor %vm268_vm5, %vm348_vm6  ;;  %vm271_vm6 = vcmp.eq.s32.totalorder %v1494_v5, %v1541_v22  ;;  %vm274_vm10 = vcmp.eq.s32.totalorder %v235_v26, %v1496_v9  ;;  %916 = vperm.xlu1 %1326, %v894_v31   ;;  %p1341_p3 = pnand %p1340_p2, %p1334_p13 }
  0x24   : > { %vm416_vm14 = vmor %vm272_vm8, %vm352_vm9 }
  0x25   : > { %vm1245_vm1 = vmpackc.low %vm416_vm14, %vm412_vm11  ;;  %vm354_vm11 = vcmp.eq.s32.totalorder %v235_v26, %v1509_v14  ;;  %vm358_vm14 = vcmp.eq.s32.totalorder %v236_v28, %v1509_v14 }
  0x26   : > { %1246 = vmatprep.subr.msk.bf16.mxu1 %vm1245_vm1, %v1396_v25  ;;  %vm409_vm2 = vmor %vm265_vm12, %vm345_vm13  ;;  %vm278_vm13 = vcmp.eq.s32.totalorder %v236_v28, %v1496_v9  ;;  %vm276_vm1 = vcmp.eq.s32.totalorder %v235_v26, %v1505_v13  ;;  %681 = vperm.xlu0 %1325, %v647_v32  }
  0x27   : > { %vm413_vm5 = vmor %vm269_vm15, %vm349_vm0  ;;  %921 = vperm.xlu1 %1326, %v895_v33  }
  0x28   : > { %vm1215_vm8 = vmpackc.low %vm413_vm5, %vm409_vm2  ;;  %vm356_vm2 = vcmp.eq.s32.totalorder %v235_v26, %v1516_v16  ;;  %vm360_vm5 = vcmp.eq.s32.totalorder %v236_v28, %v1516_v16 }
  0x29   : > { %1216 = vmatpush1.bf16.msk.msra.mxu0 %vm1215_vm8, %v1396_v25  ;;  %vm411_vm9 = vmor %vm267_vm3, %vm347_vm4  ;;  %vm280_vm4 = vcmp.eq.s32.totalorder %v236_v28, %v1505_v13  ;;  %vm273_vm8 = vcmp.eq.s32.totalorder %v235_v26, %v1526_v19 }
  0x2a   : > { %vm415_vm12 = vmor %vm271_vm6, %vm351_vm7  ;;  %686 = vperm.xlu0 %1325, %v648_v36  }
  0x2b   : > { %vm1247_vm15 = vmpackc.low %vm415_vm12, %vm411_vm9  ;;  %vm353_vm9 = vcmp.eq.s32.totalorder %v235_v26, %v1528_v20  ;;  %vm357_vm12 = vcmp.eq.s32.totalorder %v236_v28, %v1528_v20  ;;  %926 = vperm.xlu1 %1326, %v896_v37  }
  0x2c   : > { %1248 = vmatpush1.bf16.msk.msra.mxu1 %vm1247_vm15, %v1396_v25  ;;  %vm418_vm0 = vmor %vm274_vm10, %vm354_vm11  ;;  %vm277_vm11 = vcmp.eq.s32.totalorder %v236_v28, %v1526_v19  ;;  %vm275_vm15 = vcmp.eq.s32.totalorder %v235_v26, %v1541_v22 }
  0x2d   : > { %vm422_vm3 = vmor %vm278_vm13, %vm358_vm14 }
  0x2e   : > { %vm1217_vm6 = vmpackc.low %vm422_vm3, %vm418_vm0  ;;  %vm355_vm0 = vcmp.eq.s32.totalorder %v235_v26, %v1543_v23  ;;  %vm359_vm3 = vcmp.eq.s32.totalorder %v236_v28, %v1543_v23  ;;  %931 = vperm.xlu0 %1325, %v897_v38  }
  0x2f   : > { %1218 = vmatprep.subr.msk.bf16.mxu0 %vm1217_vm6, %v1396_v25  ;;  %vm420_vm7 = vmor %vm276_vm1, %vm356_vm2  ;;  %vm279_vm2 = vcmp.eq.s32.totalorder %v236_v28, %v1541_v22  ;;  %vm282_vm6 = vcmp.eq.s32.totalorder %v237_v34, %v1496_v9  ;;  %936 = vperm.xlu1 %1326, %v898_v39  }
  0x30   : > { %vm424_vm10 = vmor %vm280_vm4, %vm360_vm5 }
  0x31   : > { %vm1249_vm13 = vmpackc.low %vm424_vm10, %vm420_vm7  ;;  %vm362_vm7 = vcmp.eq.s32.totalorder %v237_v34, %v1509_v14  ;;  %vm366_vm10 = vcmp.eq.s32.totalorder %v238_v35, %v1509_v14 }
  0x32   : > { %1250 = vmatprep.subr.msk.bf16.mxu1 %vm1249_vm13, %v1396_v25  ;;  %vm417_vm14 = vmor %vm273_vm8, %vm353_vm9  ;;  %vm286_vm9 = vcmp.eq.s32.totalorder %v238_v35, %v1496_v9  ;;  %vm284_vm13 = vcmp.eq.s32.totalorder %v237_v34, %v1505_v13 }
  0x33   : > { %vm421_vm1 = vmor %vm277_vm11, %vm357_vm12 }
  0x34   : > { %vm1219_vm4 = vmpackc.low %vm421_vm1, %vm417_vm14  ;;  %vm364_vm14 = vcmp.eq.s32.totalorder %v237_v34, %v1516_v16  ;;  %vm368_vm1 = vcmp.eq.s32.totalorder %v238_v35, %v1516_v16 }
  0x35   : > { %1220 = vmatpush1.bf16.msk.msra.mxu0 %vm1219_vm4, %v1396_v25  ;;  %vm419_vm5 = vmor %vm275_vm15, %vm355_vm0  ;;  %vm288_vm0 = vcmp.eq.s32.totalorder %v238_v35, %v1505_v13  ;;  %vm281_vm4 = vcmp.eq.s32.totalorder %v237_v34, %v1526_v19 }
  0x36   : > { %vm423_vm8 = vmor %vm279_vm2, %vm359_vm3 }
  0x37   : > { %vm1251_vm11 = vmpackc.low %vm423_vm8, %vm419_vm5  ;;  %vm361_vm5 = vcmp.eq.s32.totalorder %v237_v34, %v1528_v20  ;;  %vm365_vm8 = vcmp.eq.s32.totalorder %v238_v35, %v1528_v20 }
  0x38   : > { %1252 = vmatpush1.bf16.msk.msra.mxu1 %vm1251_vm11, %v1396_v25  ;;  %vm426_vm12 = vmor %vm282_vm6, %vm362_vm7  ;;  %vm285_vm7 = vcmp.eq.s32.totalorder %v238_v35, %v1526_v19  ;;  %vm283_vm11 = vcmp.eq.s32.totalorder %v237_v34, %v1541_v22 }
  0x39   : > { %vm430_vm15 = vmor %vm286_vm9, %vm366_vm10 }
  0x3a   : > { %vm1221_vm2 = vmpackc.low %vm430_vm15, %vm426_vm12  ;;  %vm363_vm12 = vcmp.eq.s32.totalorder %v237_v34, %v1543_v23  ;;  %vm367_vm15 = vcmp.eq.s32.totalorder %v238_v35, %v1543_v23 }
  0x3b   : > { %1222 = vmatprep.subr.msk.bf16.mxu0 %vm1221_vm2, %v1396_v25  ;;  %vm428_vm3 = vmor %vm284_vm13, %vm364_vm14  ;;  %vm287_vm14 = vcmp.eq.s32.totalorder %v238_v35, %v1541_v22  ;;  %vm290_vm2 = vcmp.eq.s32.totalorder %v239_v40, %v1496_v9 }
  0x3c   : > { %vm432_vm6 = vmor %vm288_vm0, %vm368_vm1 }
  0x3d   : > { %vm1253_vm9 = vmpackc.low %vm432_vm6, %vm428_vm3  ;;  %vm370_vm3 = vcmp.eq.s32.totalorder %v239_v40, %v1509_v14  ;;  %vm374_vm6 = vcmp.eq.s32.totalorder %v240_v41, %v1509_v14 }
  0x3e   : > { %1254 = vmatprep.subr.msk.bf16.mxu1 %vm1253_vm9, %v1396_v25  ;;  %vm425_vm10 = vmor %vm281_vm4, %vm361_vm5  ;;  %vm294_vm5 = vcmp.eq.s32.totalorder %v240_v41, %v1496_v9 }
  0x3f   : > { %vm429_vm13 = vmor %vm285_vm7, %vm365_vm8  ;;  %vm292_vm8 = vcmp.eq.s32.totalorder %v239_v40, %v1505_v13 }
  0x40   : > { %vm1223_vm0 = vmpackc.low %vm429_vm13, %vm425_vm10  ;;  %vm372_vm10 = vcmp.eq.s32.totalorder %v239_v40, %v1516_v16 }
  0x41   : > { %1224 = vmatpush1.bf16.msk.msra.mxu0 %vm1223_vm0, %v1396_v25  ;;  %vm427_vm1 = vmor %vm283_vm11, %vm363_vm12  ;;  %vm296_vm11 = vcmp.eq.s32.totalorder %v240_v41, %v1505_v13  ;;  %vm376_vm12 = vcmp.eq.s32.totalorder %v240_v41, %v1516_v16 }
  0x42   : > { %vm431_vm4 = vmor %vm287_vm14, %vm367_vm15  ;;  %vm289_vm15 = vcmp.eq.s32.totalorder %v239_v40, %v1526_v19 }
  0x43   : > { %vm1255_vm9 = vmpackc.low %vm431_vm4, %vm427_vm1  ;;  %vm369_vm1 = vcmp.eq.s32.totalorder %v239_v40, %v1528_v20 }
  0x44   : > { %1256 = vmatpush1.bf16.msk.msra.mxu1 %vm1255_vm9, %v1396_v25  ;;  %vm434_vm7 = vmor %vm290_vm2, %vm370_vm3  ;;  %vm293_vm2 = vcmp.eq.s32.totalorder %v240_v41, %v1526_v19  ;;  %vm373_vm3 = vcmp.eq.s32.totalorder %v240_v41, %v1528_v20 }
  0x45   : > { %vm438_vm13 = vmor %vm294_vm5, %vm374_vm6  ;;  %vm291_vm6 = vcmp.eq.s32.totalorder %v239_v40, %v1541_v22 }
  0x46   : > { %vm1225_vm0 = vmpackc.low %vm438_vm13, %vm434_vm7  ;;  %vm371_vm7 = vcmp.eq.s32.totalorder %v239_v40, %v1543_v23  ;;  %vm375_vm13 = vcmp.eq.s32.totalorder %v240_v41, %v1543_v23 }
  0x47   : > { %1226 = vmatprep.subr.msk.bf16.mxu0 %vm1225_vm0, %v1396_v25  ;;  %vm436_vm14 = vmor %vm292_vm8, %vm372_vm10  ;;  %vm295_vm10 = vcmp.eq.s32.totalorder %v240_v41, %v1541_v22  ;;  %vm298_vm0 = vcmp.eq.s32.totalorder %v241_v42, %v1496_v9 }
  0x48   : > { %vm440_vm4 = vmor %vm296_vm11, %vm376_vm12 }
  0x49   : > { %vm1257_vm9 = vmpackc.low %vm440_vm4, %vm436_vm14  ;;  %vm378_vm14 = vcmp.eq.s32.totalorder %v241_v42, %v1509_v14  ;;  %vm382_vm4 = vcmp.eq.s32.totalorder %v242_v43, %v1509_v14 }
  0x4a   : > { %1258 = vmatprep.subr.msk.bf16.mxu1 %vm1257_vm9, %v1396_v25  ;;  %vm433_vm5 = vmor %vm289_vm15, %vm369_vm1  ;;  %vm302_vm1 = vcmp.eq.s32.totalorder %v242_v43, %v1496_v9 }
  0x4b   : > { %vm437_vm8 = vmor %vm293_vm2, %vm373_vm3  ;;  %vm300_vm3 = vcmp.eq.s32.totalorder %v241_v42, %v1505_v13 }
  0x4c   : > { %vm1227_vm11 = vmpackc.low %vm437_vm8, %vm433_vm5  ;;  %vm380_vm5 = vcmp.eq.s32.totalorder %v241_v42, %v1516_v16 }
  0x4d   : > { %1228 = vmatpush1.bf16.msk.msra.mxu0 %vm1227_vm11, %v1396_v25  ;;  %vm435_vm12 = vmor %vm291_vm6, %vm371_vm7  ;;  %vm304_vm6 = vcmp.eq.s32.totalorder %v242_v43, %v1505_v13  ;;  %vm384_vm7 = vcmp.eq.s32.totalorder %v242_v43, %v1516_v16 }
  0x4e   : > { %vm439_vm15 = vmor %vm295_vm10, %vm375_vm13  ;;  %vm297_vm13 = vcmp.eq.s32.totalorder %v241_v42, %v1526_v19 }
  0x4f   : > { %vm1259_vm9 = vmpackc.low %vm439_vm15, %vm435_vm12  ;;  %vm377_vm12 = vcmp.eq.s32.totalorder %v241_v42, %v1528_v20 }
  0x50   : > { %1260 = vmatpush1.bf16.msk.msra.mxu1 %vm1259_vm9, %v1396_v25  ;;  %vm442_vm2 = vmor %vm298_vm0, %vm378_vm14  ;;  %vm301_vm0 = vcmp.eq.s32.totalorder %v242_v43, %v1526_v19  ;;  %vm381_vm14 = vcmp.eq.s32.totalorder %v242_v43, %v1528_v20 }
  0x51   : > { %vm446_vm8 = vmor %vm302_vm1, %vm382_vm4  ;;  %vm299_vm4 = vcmp.eq.s32.totalorder %v241_v42, %v1541_v22 }
  0x52   : > { %vm1229_vm11 = vmpackc.low %vm446_vm8, %vm442_vm2  ;;  %vm379_vm2 = vcmp.eq.s32.totalorder %v241_v42, %v1543_v23  ;;  %vm383_vm8 = vcmp.eq.s32.totalorder %v242_v43, %v1543_v23 }
  0x53   : > { %1230 = vmatprep.subr.msk.bf16.mxu0 %vm1229_vm11, %v1396_v25  ;;  %vm444_vm10 = vmor %vm300_vm3, %vm380_vm5  ;;  %vm303_vm5 = vcmp.eq.s32.totalorder %v242_v43, %v1541_v22  ;;  %vm306_vm11 = vcmp.eq.s32.totalorder %v243_v44, %v1496_v9 }
  0x54   : > { %vm448_vm15 = vmor %vm304_vm6, %vm384_vm7 }
  0x55   : > { %vm1261_vm9 = vmpackc.low %vm448_vm15, %vm444_vm10  ;;  %vm386_vm10 = vcmp.eq.s32.totalorder %v243_v44, %v1509_v14  ;;  %vm390_vm15 = vcmp.eq.s32.totalorder %v244_v45, %v1509_v14 }
  0x56   : > { %1262 = vmatprep.subr.msk.bf16.mxu1 %vm1261_vm9, %v1396_v25  ;;  %vm441_vm1 = vmor %vm297_vm13, %vm377_vm12  ;;  %vm310_vm12 = vcmp.eq.s32.totalorder %v244_v45, %v1496_v9 }
  0x57   : > { %vm445_vm3 = vmor %vm301_vm0, %vm381_vm14  ;;  %vm308_vm14 = vcmp.eq.s32.totalorder %v243_v44, %v1505_v13 }
  0x58   : > { %vm1231_vm6 = vmpackc.low %vm445_vm3, %vm441_vm1  ;;  %vm388_vm1 = vcmp.eq.s32.totalorder %v243_v44, %v1516_v16 }
  0x59   : > { %1232 = vmatpush1.bf16.msk.msra.mxu0 %vm1231_vm6, %v1396_v25  ;;  %vm443_vm7 = vmor %vm299_vm4, %vm379_vm2  ;;  %vm312_vm4 = vcmp.eq.s32.totalorder %v244_v45, %v1505_v13  ;;  %vm392_vm2 = vcmp.eq.s32.totalorder %v244_v45, %v1516_v16 }
  0x5a   : > { %vm447_vm13 = vmor %vm303_vm5, %vm383_vm8  ;;  %vm305_vm8 = vcmp.eq.s32.totalorder %v243_v44, %v1526_v19 }
  0x5b   : > { %vm1263_vm9 = vmpackc.low %vm447_vm13, %vm443_vm7  ;;  %vm385_vm7 = vcmp.eq.s32.totalorder %v243_v44, %v1528_v20 }
  0x5c   : > { %1264 = vmatpush1.bf16.msk.msra.mxu1 %vm1263_vm9, %v1396_v25  ;;  %vm450_vm0 = vmor %vm306_vm11, %vm386_vm10  ;;  %vm309_vm11 = vcmp.eq.s32.totalorder %v244_v45, %v1526_v19  ;;  %vm389_vm10 = vcmp.eq.s32.totalorder %v244_v45, %v1528_v20 }
  0x5d   : > { %vm454_vm3 = vmor %vm310_vm12, %vm390_vm15  ;;  %vm307_vm15 = vcmp.eq.s32.totalorder %v243_v44, %v1541_v22 }
  0x5e   : > { %vm1233_vm6 = vmpackc.low %vm454_vm3, %vm450_vm0  ;;  %vm387_vm0 = vcmp.eq.s32.totalorder %v243_v44, %v1543_v23  ;;  %vm391_vm3 = vcmp.eq.s32.totalorder %v244_v45, %v1543_v23 }
  0x5f   : > { %1234 = vmatprep.subr.msk.bf16.mxu0 %vm1233_vm6, %v1396_v25  ;;  %vm452_vm5 = vmor %vm308_vm14, %vm388_vm1  ;;  %vm311_vm1 = vcmp.eq.s32.totalorder %v244_v45, %v1541_v22  ;;  %vm314_vm6 = vcmp.eq.s32.totalorder %v245_v46, %v1496_v9 }
  0x60   : > { %vm456_vm13 = vmor %vm312_vm4, %vm392_vm2 }
  0x61   : > { %vm1265_vm9 = vmpackc.low %vm456_vm13, %vm452_vm5  ;;  %vm394_vm5 = vcmp.eq.s32.totalorder %v245_v46, %v1509_v14  ;;  %vm398_vm13 = vcmp.eq.s32.totalorder %v246_v47, %v1509_v14 }
  0x62   : > { %1266 = vmatprep.subr.msk.bf16.mxu1 %vm1265_vm9, %v1396_v25  ;;  %vm449_vm12 = vmor %vm305_vm8, %vm385_vm7  ;;  %vm318_vm7 = vcmp.eq.s32.totalorder %v246_v47, %v1496_v9 }
  0x63   : > { %vm453_vm14 = vmor %vm309_vm11, %vm389_vm10  ;;  %vm316_vm10 = vcmp.eq.s32.totalorder %v245_v46, %v1505_v13 }
  0x64   : > { %vm1235_vm4 = vmpackc.low %vm453_vm14, %vm449_vm12  ;;  %vm396_vm12 = vcmp.eq.s32.totalorder %v245_v46, %v1516_v16 }
  0x65   : > { %1236 = vmatpush1.bf16.msk.msra.mxu0 %vm1235_vm4, %v1396_v25  ;;  %vm451_vm2 = vmor %vm307_vm15, %vm387_vm0  ;;  %vm320_vm15 = vcmp.eq.s32.totalorder %v246_v47, %v1505_v13  ;;  %vm400_vm0 = vcmp.eq.s32.totalorder %v246_v47, %v1516_v16 }
  0x66   : > { %vm455_vm8 = vmor %vm311_vm1, %vm391_vm3  ;;  %vm313_vm3 = vcmp.eq.s32.totalorder %v245_v46, %v1526_v19 }
  0x67   : > { %vm1267_vm9 = vmpackc.low %vm455_vm8, %vm451_vm2  ;;  %vm393_vm2 = vcmp.eq.s32.totalorder %v245_v46, %v1528_v20 }
  0x68   : > { %1268 = vmatpush1.bf16.msk.msra.mxu1 %vm1267_vm9, %v1396_v25  ;;  %vm458_vm11 = vmor %vm314_vm6, %vm394_vm5  ;;  %vm317_vm6 = vcmp.eq.s32.totalorder %v246_v47, %v1526_v19  ;;  %vm397_vm5 = vcmp.eq.s32.totalorder %v246_v47, %v1528_v20 }
  0x69   : > { %vm462_vm14 = vmor %vm318_vm7, %vm398_vm13  ;;  %vm315_vm13 = vcmp.eq.s32.totalorder %v245_v46, %v1541_v22 }
  0x6a   : > { %vm1237_vm4 = vmpackc.low %vm462_vm14, %vm458_vm11  ;;  %vm395_vm11 = vcmp.eq.s32.totalorder %v245_v46, %v1543_v23  ;;  %vm399_vm14 = vcmp.eq.s32.totalorder %v246_v47, %v1543_v23 }
  0x6b   : > { %1238 = vmatprep.subr.msk.bf16.mxu0 %vm1237_vm4, %v1396_v25  ;;  %vm460_vm1 = vmor %vm316_vm10, %vm396_vm12  ;;  %vm319_vm12 = vcmp.eq.s32.totalorder %v246_v47, %v1541_v22  ;;  %vm322_vm4 = vcmp.eq.s32.totalorder %v247_v48, %v1496_v9 }
  0x6c   : > { %vm464_vm8 = vmor %vm320_vm15, %vm400_vm0 }
  0x6d   : > { %vm1269_vm9 = vmpackc.low %vm464_vm8, %vm460_vm1  ;;  %vm402_vm1 = vcmp.eq.s32.totalorder %v247_v48, %v1509_v14  ;;  %vm406_vm8 = vcmp.eq.s32.totalorder %v248_v49, %v1509_v14 }
  0x6e   : > { %1270 = vmatprep.subr.msk.bf16.mxu1 %vm1269_vm9, %v1396_v25  ;;  %vm457_vm7 = vmor %vm313_vm3, %vm393_vm2  ;;  %vm326_vm2 = vcmp.eq.s32.totalorder %v248_v49, %v1496_v9 }
  0x6f   : > { %vm461_vm10 = vmor %vm317_vm6, %vm397_vm5  ;;  %vm324_vm5 = vcmp.eq.s32.totalorder %v247_v48, %v1505_v13 }
  0x70   : > { %vm1239_vm15 = vmpackc.low %vm461_vm10, %vm457_vm7  ;;  %vm404_vm7 = vcmp.eq.s32.totalorder %v247_v48, %v1516_v16 }
  0x71   : > { %1240 = vmatpush1.bf16.msk.msra.mxu0 %vm1239_vm15, %v1396_v25  ;;  %vm459_vm0 = vmor %vm315_vm13, %vm395_vm11  ;;  %vm328_vm13 = vcmp.eq.s32.totalorder %v248_v49, %v1505_v13  ;;  %vm408_vm11 = vcmp.eq.s32.totalorder %v248_v49, %v1516_v16 }
  0x72   : > { %vm463_vm3 = vmor %vm319_vm12, %vm399_vm14  ;;  %vm321_vm14 = vcmp.eq.s32.totalorder %v247_v48, %v1526_v19 }
  0x73   : > { %vm1271_vm9 = vmpackc.low %vm463_vm3, %vm459_vm0  ;;  %vm401_vm0 = vcmp.eq.s32.totalorder %v247_v48, %v1528_v20 }
  0x74   : > { %1272 = vmatpush1.bf16.msk.msra.mxu1 %vm1271_vm9, %v1396_v25  ;;  %vm466_vm6 = vmor %vm322_vm4, %vm402_vm1  ;;  %vm325_vm4 = vcmp.eq.s32.totalorder %v248_v49, %v1526_v19  ;;  %vm405_vm1 = vcmp.eq.s32.totalorder %v248_v49, %v1528_v20 }
  0x75   : > { %vm470_vm10 = vmor %vm326_vm2, %vm406_vm8  ;;  %vm323_vm8 = vcmp.eq.s32.totalorder %v247_v48, %v1541_v22 }
  0x76   : > { %vm1241_vm15 = vmpackc.low %vm470_vm10, %vm466_vm6  ;;  %vm403_vm6 = vcmp.eq.s32.totalorder %v247_v48, %v1543_v23 }
  0x77   : > { %1242 = vmatprep.subr.msk.bf16.mxu0 %vm1241_vm15, %v1396_v25  ;;  %vm468_vm12 = vmor %vm324_vm5, %vm404_vm7  ;;  %vm327_vm5 = vcmp.eq.s32.totalorder %v248_v49, %v1541_v22  ;;  %vm407_vm7 = vcmp.eq.s32.totalorder %v248_v49, %v1543_v23 }
  0x78   : > { %vm472_vm3 = vmor %vm328_vm13, %vm408_vm11 }
  0x79   : > { %vm1273_vm9 = vmpackc.low %vm472_vm3, %vm468_vm12 }
  0x7a   : > { %1274 = vmatprep.subr.msk.bf16.mxu1 %vm1273_vm9, %v1396_v25  ;;  %vm465_vm2 = vmor %vm321_vm14, %vm401_vm0  ;;  %vm1060_vm14 = vcmp.lt.s32.totalorder %v232_v0, 512 }
  0x7b   : > { %vm469_vm10 = vmor %vm325_vm4, %vm405_vm1 }
  0x7c   : > { %vm1243_vm15 = vmpackc.low %vm469_vm10, %vm465_vm2 }
  0x7d   : > { %1244 = vmatpush1.bf16.msk.msra.mxu0 %vm1243_vm15, %v1396_v25  ;;  %vm467_vm13 = vmor %vm323_vm8, %vm403_vm6 }
  0x7e   : > { %vm471_vm11 = vmor %vm327_vm5, %vm407_vm7 }
  0x7f   : > { %vm1275_vm12 = vmpackc.low %vm471_vm11, %vm467_vm13 }
  0x80   : > { %1276 = vmatpush1.bf16.msk.msra.mxu1 %vm1275_vm12, %v1396_v25  ;;  %746 = vmatmul.mubr.bf16.vlgmr.msra.gmra.mrb[0].mxu0 %v1327_v50 }
  0x81   : > { %755 = vmatprep.mubr.bf16.mxu0 %v1395_v1 }
  0x83   : > { %819 = vmatmul.mubr.bf16.vlgmr.msra.gmra.mrb[0].mxu1 %v1327_v50 }
  0x84   : > { %828 = vmatprep.mubr.bf16.mxu1 %v1395_v1 }
  0x88   : > { %756 = vmatmul.mubr.bf16.gmra.mrb[4].mxu0 %v1328_v51 }
  0x89   : > { %765 = vmatprep.mubr.bf16.mxu0 %v1395_v1 }
  0x8b   : > { %829 = vmatmul.mubr.bf16.gmra.mrb[4].mxu1 %v1328_v51 }
  0x8c   : > { %838 = vmatprep.mubr.bf16.mxu1 %v1395_v1 }
  0x90   : > { %766 = vmatmul.mubr.bf16.gmra.mrb[8].mxu0 %v1329_v52 }
  0x91   : > { %775 = vmatprep.mubr.bf16.mxu0 %v1395_v1  ;;  %v652_v54 = vpop.permute.xlu0 %651  ;;  %v662_v55 = vpop.permute.xlu1 %661 }
  0x93   : > { %839 = vmatmul.mubr.bf16.gmra.mrb[8].mxu1 %v1329_v52 }
  0x94   : > { %848 = vmatprep.mubr.bf16.mxu1 %v1395_v1 }
  0x95   : > { %v657_v56 = vpop.permute.xlu0 %656  ;;  %v1770_v57 = vpop.permute.xlu1 %666 }
  0x98   : > { %776 = vmatmul.mubr.bf16.gmra.mrb[12].mxu0 %v1330_v53 }
  0x99   : > { %v902_v58 = vpop.permute.xlu0 %901  ;;  %v907_v59 = vpop.permute.xlu1 %906 }
  0x9b   : > { %849 = vmatmul.mubr.bf16.gmra.mrb[12].mxu1 %v1330_v53 }
  0x9d   : > { %v1772_v63 = vpop.permute.xlu0 %671 }
  0x9e   : > { %v1774_v8 = vpop.permute.xlu1 %911 }
  0xa1   : > { %v1776_v28 = vpop.permute.xlu0 %676 }
  0xa2   : > { %v917_v33 = vpop.permute.xlu1 %916 }
 0x153   : > { %v747_v60 = vpop.f32.mrb[0].mxu0 }
 0x154   : > { %v748_v61 = vadd.f32 %v747_v60, %v652_v54  ;;  %v749_v62 = vpop.f32.mrb[1].mxu0 }
 0x155   : > { %v750_v3 = vadd.f32 %v749_v62, %v652_v54  ;;  %v751_v1 = vpop.f32.mrb[2].mxu0  ;;  %v1783_v62 = vpop.permute.xlu0 %681 }
 0x156   : > { %v859_v4 = vmax.f32 %v748_v61, 0.0  ;;  %v820_v5 = vpop.f32.mrb[0].mxu1  ;;  %v752_v6 = vadd.f32 %v751_v1, %v657_v56  ;;  %v753_v7 = vpop.f32.mrb[3].mxu0 }
 0x157   : > { %v821_v9 = vadd.f32 %v820_v5, %v652_v54  ;;  %v860_v10 = vmax.f32 %v750_v3, 0.0  ;;  %v822_v11 = vpop.f32.mrb[1].mxu1  ;;  %v754_v12 = vadd.f32 %v753_v7, %v657_v56 }
 0x158   : > { %v823_v13 = vadd.f32 %v822_v11, %v652_v54  ;;  %v863_v14 = vmax.f32 %v752_v6, 0.0  ;;  %v824_v15 = vpop.f32.mrb[2].mxu1  ;;  %v939_v20 = vmul.f32 %v902_v58, %v859_v4  ;;  %v922_v6 = vpop.permute.xlu1 %921 }
 0x159   : > { %v861_v16 = vmax.f32 %v821_v9, 0.0  ;;  %v825_v17 = vadd.f32 %v824_v15, %v657_v56  ;;  %v864_v18 = vmax.f32 %v754_v12, 0.0  ;;  %v826_v19 = vpop.f32.mrb[3].mxu1  ;;  %v940_v24 = vmul.f32 %v902_v58, %v860_v10 }
 0x15a   : > { %v862_v21 = vmax.f32 %v823_v13, 0.0  ;;  %v943_v22 = vmul.f32 %v907_v59, %v863_v14  ;;  %v827_v23 = vadd.f32 %v826_v19, %v657_v56 }
 0x15b   : > { %v865_v25 = vmax.f32 %v825_v17, 0.0  ;;  %v944_v26 = vmul.f32 %v907_v59, %v864_v18  ;;  %v757_v27 = vpop.f32.mrb[4].mxu0  ;;  %v941_v34 = vmul.f32 %v902_v58, %v861_v16 }
 0x15c   : > { %v971_v29 = vadd.f32 %v943_v22, %v939_v20  ;;  %v866_v30 = vmax.f32 %v827_v23, 0.0  ;;  %v758_v31 = vadd.f32 %v757_v27, %v662_v55  ;;  %v759_v32 = vpop.f32.mrb[5].mxu0  ;;  %v942_v39 = vmul.f32 %v902_v58, %v862_v21 }
 0x15d   : > { %v945_v35 = vmul.f32 %v907_v59, %v865_v25  ;;  %v984_v36 = vadd.f32 %v944_v26, %v940_v24  ;;  %v760_v37 = vadd.f32 %v759_v32, %v662_v55  ;;  %v761_v38 = vpop.f32.mrb[6].mxu0  ;;  %v687_v32 = vpop.permute.xlu0 %686 }
 0x15e   : > { %v946_v40 = vmul.f32 %v907_v59, %v866_v30  ;;  %v867_v41 = vmax.f32 %v758_v31, 0.0  ;;  %v830_v42 = vpop.f32.mrb[4].mxu1  ;;  %v762_v43 = vadd.f32 %v761_v38, %v1770_v57  ;;  %v763_v44 = vpop.f32.mrb[7].mxu0 }
 0x15f   : > { %v997_v45 = vadd.f32 %v945_v35, %v941_v34  ;;  %v831_v46 = vadd.f32 %v830_v42, %v662_v55  ;;  %v868_v47 = vmax.f32 %v760_v37, 0.0  ;;  %v832_v48 = vpop.f32.mrb[5].mxu1  ;;  %v764_v49 = vadd.f32 %v763_v44, %v1770_v57 }
 0x160   : > { %v1010_v50 = vadd.f32 %v946_v40, %v942_v39  ;;  %v947_v51 = vmul.f32 %v1774_v8, %v867_v41  ;;  %v833_v52 = vadd.f32 %v832_v48, %v662_v55  ;;  %v871_v53 = vmax.f32 %v762_v43, 0.0  ;;  %v834_v54 = vpop.f32.mrb[6].mxu1 }
 0x161   : > { %v869_v56 = vmax.f32 %v831_v46, 0.0  ;;  %v948_v58 = vmul.f32 %v1774_v8, %v868_v47  ;;  %v835_v59 = vadd.f32 %v834_v54, %v1770_v57  ;;  %v872_v60 = vmax.f32 %v764_v49, 0.0  ;;  %v836_v61 = vpop.f32.mrb[7].mxu1 }
 0x162   : > { %v972_v3 = vadd.f32 %v971_v29, %v947_v51  ;;  %v870_v1 = vmax.f32 %v833_v52, 0.0  ;;  %v951_v4 = vmul.f32 %v917_v33, %v871_v53  ;;  %v837_v5 = vadd.f32 %v836_v61, %v1770_v57 }
 0x163   : > { %v949_v7 = vmul.f32 %v1774_v8, %v869_v56  ;;  %v985_v55 = vadd.f32 %v984_v36, %v948_v58  ;;  %v873_v9 = vmax.f32 %v835_v59, 0.0  ;;  %v952_v10 = vmul.f32 %v917_v33, %v872_v60  ;;  %v767_v11 = vpop.f32.mrb[8].mxu0 }
 0x164   : > { %v950_v12 = vmul.f32 %v1774_v8, %v870_v1  ;;  %v973_v13 = vadd.f32 %v972_v3, %v951_v4  ;;  %v874_v14 = vmax.f32 %v837_v5, 0.0  ;;  %v768_v15 = vadd.f32 %v767_v11, %v1772_v63  ;;  %v769_v16 = vpop.f32.mrb[9].mxu0 }
 0x165   : > { %v998_v17 = vadd.f32 %v997_v45, %v949_v7  ;;  %v953_v18 = vmul.f32 %v917_v33, %v873_v9  ;;  %v986_v19 = vadd.f32 %v985_v55, %v952_v10  ;;  %v770_v20 = vadd.f32 %v769_v16, %v1772_v63  ;;  %v771_v57 = vpop.f32.mrb[10].mxu0  ;;  %v932_v10 = vpop.permute.xlu0 %931 }
 0x166   : > { %v1011_v21 = vadd.f32 %v1010_v50, %v950_v12  ;;  %v954_v22 = vmul.f32 %v917_v33, %v874_v14  ;;  %v875_v23 = vmax.f32 %v768_v15, 0.0  ;;  %v840_v24 = vpop.f32.mrb[8].mxu1  ;;  %v772_v25 = vadd.f32 %v771_v57, %v1776_v28  ;;  %v773_v26 = vpop.f32.mrb[11].mxu0 }
 0x167   : > { %v999_v27 = vadd.f32 %v998_v17, %v953_v18  ;;  %v841_v8 = vadd.f32 %v840_v24, %v1772_v63  ;;  %v876_v29 = vmax.f32 %v770_v20, 0.0  ;;  %v842_v30 = vpop.f32.mrb[9].mxu1  ;;  %v774_v31 = vadd.f32 %v773_v26, %v1776_v28  ;;  %v927_v33 = vpop.permute.xlu1 %926 }
 0x168   : > { %v1012_v34 = vadd.f32 %v1011_v21, %v954_v22  ;;  %v955_v35 = vmul.f32 %v922_v6, %v875_v23  ;;  %v843_v36 = vadd.f32 %v842_v30, %v1772_v63  ;;  %v879_v37 = vmax.f32 %v772_v25, 0.0  ;;  %v844_v38 = vpop.f32.mrb[10].mxu1 }
 0x169   : > { %v877_v39 = vmax.f32 %v841_v8, 0.0  ;;  %v956_v40 = vmul.f32 %v922_v6, %v876_v29  ;;  %v845_v41 = vadd.f32 %v844_v38, %v1776_v28  ;;  %v880_v42 = vmax.f32 %v774_v31, 0.0  ;;  %v846_v43 = vpop.f32.mrb[11].mxu1 }
 0x16a   : > { %v974_v44 = vadd.f32 %v973_v13, %v955_v35  ;;  %v878_v45 = vmax.f32 %v843_v36, 0.0  ;;  %v959_v46 = vmul.f32 %v927_v33, %v879_v37  ;;  %v847_v47 = vadd.f32 %v846_v43, %v1776_v28 }
 0x16b   : > { %v957_v48 = vmul.f32 %v922_v6, %v877_v39  ;;  %v987_v49 = vadd.f32 %v986_v19, %v956_v40  ;;  %v881_v50 = vmax.f32 %v845_v41, 0.0  ;;  %v960_v51 = vmul.f32 %v927_v33, %v880_v42  ;;  %v777_v52 = vpop.f32.mrb[12].mxu0  ;;  %v937_v20 = vpop.permute.xlu1 %936 }
 0x16c   : > { %v958_v63 = vmul.f32 %v922_v6, %v878_v45  ;;  %v975_v53 = vadd.f32 %v974_v44, %v959_v46  ;;  %v882_v54 = vmax.f32 %v847_v47, 0.0  ;;  %v778_v56 = vadd.f32 %v777_v52, %v1783_v62  ;;  %v779_v58 = vpop.f32.mrb[13].mxu0 }
 0x16d   : > { %v1000_v59 = vadd.f32 %v999_v27, %v957_v48  ;;  %v961_v60 = vmul.f32 %v927_v33, %v881_v50  ;;  %v988_v61 = vadd.f32 %v987_v49, %v960_v51  ;;  %v780_v3 = vadd.f32 %v779_v58, %v1783_v62  ;;  %v781_v1 = vpop.f32.mrb[14].mxu0 }
 0x16e   : > { %v1013_v4 = vadd.f32 %v1012_v34, %v958_v63  ;;  %v962_v5 = vmul.f32 %v927_v33, %v882_v54  ;;  %v883_v28 = vmax.f32 %v778_v56, 0.0  ;;  %v850_v7 = vpop.f32.mrb[12].mxu1  ;;  %v782_v55 = vadd.f32 %v781_v1, %v687_v32  ;;  %v783_v9 = vpop.f32.mrb[15].mxu0 }
 0x16f   : > { %v1001_v11 = vadd.f32 %v1000_v59, %v961_v60  ;;  %v851_v6 = vadd.f32 %v850_v7, %v1783_v62  ;;  %v884_v12 = vmax.f32 %v780_v3, 0.0  ;;  %v852_v13 = vpop.f32.mrb[13].mxu1  ;;  %v784_v14 = vadd.f32 %v783_v9, %v687_v32 }
 0x170   : > { %v1014_v15 = vadd.f32 %v1013_v4, %v962_v5  ;;  %v963_v16 = vmul.f32 %v932_v10, %v883_v28  ;;  %v853_v17 = vadd.f32 %v852_v13, %v1783_v62  ;;  %v887_v18 = vmax.f32 %v782_v55, 0.0  ;;  %v854_v19 = vpop.f32.mrb[14].mxu1 }
 0x171   : > { %v885_v57 = vmax.f32 %v851_v6, 0.0  ;;  %v964_v21 = vmul.f32 %v932_v10, %v884_v12  ;;  %v855_v22 = vadd.f32 %v854_v19, %v687_v32  ;;  %v888_v23 = vmax.f32 %v784_v14, 0.0  ;;  %v856_v24 = vpop.f32.mrb[15].mxu1 }
 0x172   : > { %v976_v25 = vadd.f32 %v975_v53, %v963_v16  ;;  %v886_v26 = vmax.f32 %v853_v17, 0.0  ;;  %v967_v27 = vmul.f32 %v937_v20, %v887_v18  ;;  %v857_v8 = vadd.f32 %v856_v24, %v687_v32 }
 0x173   : > { %v965_v29 = vmul.f32 %v932_v10, %v885_v57  ;;  %v989_v30 = vadd.f32 %v988_v61, %v964_v21  ;;  %v889_v31 = vmax.f32 %v855_v22, 0.0  ;;  %v968_v34 = vmul.f32 %v937_v20, %v888_v23 }
 0x174   : > { %v966_v35 = vmul.f32 %v932_v10, %v886_v26  ;;  %v977_v36 = vadd.f32 %v976_v25, %v967_v27  ;;  %v890_v37 = vmax.f32 %v857_v8, 0.0  ;;  %v1397_v63 = vmov 1966171168  }
 0x175   : > { %v1002_v62 = vadd.f32 %v1001_v11, %v965_v29  ;;  %v969_v38 = vmul.f32 %v937_v20, %v889_v31  ;;  %v990_v33 = vadd.f32 %v989_v30, %v968_v34  ;;  %v1036_v53 = vunpack.c.l.s4 %v1397_v63 }
 0x176   : > { %v1015_v39 = vadd.f32 %v1014_v15, %v966_v35  ;;  %v978_v40 = vrot.slane %v977_v36, 4  ;;  %v970_v41 = vmul.f32 %v937_v20, %v890_v37  ;;  %v1024_v60 = vstv %s1023_s17 }
 0x177   : > { %v1003_v42 = vadd.f32 %v1002_v62, %v969_v38  ;;  %v991_v43 = vrot.slane %v990_v33, 4  ;;  %v1037_v5 = vunpack.c.0.s8 %v1036_v53 }
 0x178   : > { %v979_v44 = vadd.f32 %v978_v40, %v977_v36  ;;  %v1016_v45 = vadd.f32 %v1015_v39, %v970_v41 }
 0x179   : > { %v1004_v46 = vrot.slane %v1003_v42, 4  ;;  %v992_v32 = vadd.f32 %v991_v43, %v990_v33  ;;  %v1040_v12 = vsub.s32 %v1037_v5, %v1484_v2 }
 0x17a   : > { %v980_v47 = vrot.slane %v979_v44, 2  ;;  %v1017_v48 = vrot.slane %v1016_v45, 4 }
 0x17b   : > { %v1005_v49 = vadd.f32 %v1004_v46, %v1003_v42  ;;  %v993_v50 = vrot.slane %v992_v32, 2 }
 0x17c   : > { %v981_v51 = vadd.f32 %v980_v47, %v979_v44  ;;  %v1018_v52 = vadd.f32 %v1017_v48, %v1016_v45 }
 0x17d   : > { %v1006_v54 = vrot.slane %v1005_v49, 2  ;;  %v994_v56 = vadd.f32 %v993_v50, %v992_v32 }
 0x17e   : > { %v982_v58 = vrot.slane %v981_v51, 1  ;;  %v1019_v59 = vrot.slane %v1018_v52, 2 }
 0x17f   : > { %v1007_v61 = vadd.f32 %v1006_v54, %v1005_v49  ;;  %v995_v3 = vrot.slane %v994_v56, 1 }
 0x180   : > { %v983_v1 = vadd.f32 %v982_v58, %v981_v51  ;;  %v1020_v4 = vadd.f32 %v1019_v59, %v1018_v52 }
 0x181   : > { %v1008_v28 = vrot.slane %v1007_v61, 1  ;;  %v996_v7 = vadd.f32 %v995_v3, %v994_v56 }
 0x182   : > { %v1025_v55 = vadd.f32 %v1024_v60, %v983_v1  ;;  %v1021_v9 = vrot.slane %v1020_v4, 1 }
 0x183   : > { %v1009_v10 = vadd.f32 %v1008_v28, %v1007_v61  ;;  %v1026_v11 = vadd.f32 %v1024_v60, %v996_v7 }
 0x184   : > { %v1022_v6 = vadd.f32 %v1021_v9, %v1020_v4 }
 0x185   : > { %v1027_v13 = vadd.f32 %v1024_v60, %v1009_v10  ;;  %v1033_v14 = vcombine.low %v1025_v55, %v1026_v11 }
 0x186   : > { %v1028_v15 = vadd.f32 %v1024_v60, %v1022_v6 }
 0x187   : > { %v1041_v17 = vrot.slane %v1033_v14, %v1040_v12 }
 0x188   : > { %v1034_v16 = vcombine.low %v1027_v13, %v1028_v15 }
 0x18a   : > { %v1048_v18 = vrot.slane %v1034_v16, %v1040_v12 }
 0x18c   : > { %v1049_v19 = vcombine.low %v1041_v17, %v1048_v18 }
 0x18e   : > { %v1056_v20 = vrot.slane %v1049_v19, %v1040_v12 }
 0x190   : > { %1062 = vst.msk [vmem:[%s219_s26] sm:$0xf] %vm1060_vm14, %v1056_v20 }
 0x191   : > { %1344 = shalt.err (!%p1341_p3)
}
 0x192   : > { %s1345_s13 = scalar_lea.hbm %s1807_s8, 64  ;;  %s1349_s16 = scalar_lea.hbm %s1854_s5, 128 }
 0x193   : > { %p1346_p4 = scmp.ne.s32.totalorder %s1807_s8, %s1345_s13  ;;  %p1350_p9 = scmp.lt.u32.totalorder %s1807_s8, %s1854_s5 }
 0x194   : > { %p1351_p10 = scmp.lt.u32.totalorder %s1349_s16, %s1345_s13  ;;  %p1353_p12 = scmp.lt.u32.totalorder %s1345_s13, %s1807_s8 }
 0x195   : > { %p1347_p7 = pnand %p1346_p4, %p1470_p5 }
 0x196   : > { %p1352_p11 = por %p1351_p10, %p1350_p9 }
 0x197   : > { %p1348_p8 = pneg %p1347_p7 }
 0x198   : > { %p1354_p13 = por %p1353_p12, %p1352_p11 }
 0x19a   : > { %p1355_p0 = pnand %p1354_p13, %p1348_p8 }
 0x19c   : > { %1358 = shalt.err (!%p1355_p0)
}
 0x19d   : > { %1283 = dma.vmem_to_hbm [thread:$0]  (%p1470_p5), %s1809_s27, 64, %s1807_s8, %s1064_s9  }
 0x19e PF: > { %p1289_p1 = scmp.ge.s32.totalorder %s1393_s23, 2  ;;  %s1090_s19 = sand.u32 1, %s1381_s20  }
 0x19f   : > { %s1091_s24 = scalar_lea.sflag [#allocation4], %s1090_s19 }
 0x1a0   : > { %p1286_p2 = pnand %p1289_p1, %p1474_p6 }
 0x1a2   : > { %1376 = dma.done.wait (!%p1286_p2), %s1091_s24, 64  }
 0x1a3   : > { %1378 = vsyncadd (!%p1286_p2), %s1091_s24, 4294967232  ;;  %p16_p3 = scmp.ge.s32.totalorder %s1457_s25, 4   ;;  %s1857_s20 = smov %s1385_s21 }
 0x1a4   : > { %s1858_s21 = smov %s1389_s22  ;;  %s1859_s22 = smov %s1468_s28 }
 0x1a5   : > { %s1860_s23 = smov %s1457_s25  ;;  %18 = sbr.rel (!%p16_p3) target bundleno = 5 (0x5), region = 76 }
 0x1ac   :  { %1096 = vsyncpa [#allocation4], 1 }
 0x1ad   :  { %1098 = vsyncpa [#allocation4 + $0x1], 1 }

</bundles_post_ra>
